<compile_context>
chip_gen: v7x
topology: tpu7x:2x2x1
jax: 0.10.0
libtpu: 0.0.40
codegen_flags: <defaults>
</compile_context>

<pallas_src>
import functools

import jax
import jax.numpy as jnp
from jax.experimental import pallas as pl
from jax.experimental.pallas import tpu as pltpu


_VMEM = pl.BlockSpec(memory_space=pltpu.MemorySpace.VMEM)


def _round_up(x, m):
    return (x + m - 1) // m * m


# ----------------------------------------------------------------------------
# Fused Pallas kernel
# ----------------------------------------------------------------------------
def _make_fused_kernel(filter_heights, out_chs, batch, seq_len, s_pad,
                       matmul_dtype):
    """Conv(all branches, packed) + bias + ReLU + max-pool + Linear + sigmoid."""
    fhs = tuple(int(f) for f in filter_heights)
    n_f = len(fhs)
    max_fh = max(fhs)
    nc = n_f * out_chs                          # packed channel count
    rows = batch * s_pad                        # flattened (batch, seq) rows

    def kernel(emb_ref, w_ref, b_ref, fcw_ref, fcb_ref, o_ref):
        # emb_ref: (rows_padded, E)   w_ref: (max_fh, E, NC)
        # b_ref:   (1, NC)            fcw_ref: (NC, 1)   fcb_ref: (1, 1)
        # o_ref:   (B, 1)
        emb = emb_ref[...].astype(matmul_dtype)

        # Packed conv: conv_f(l) = sum_{i<fh_f} emb[l+i] @ w_f[i]; branches with
        # i >= fh_f have zero-padded weights so the shared accumulation is exact.
        acc = jnp.zeros((rows, nc), jnp.float32)
        for i in range(max_fh):                               # static, <= 5
            acc = acc + jnp.dot(emb[i:i + rows, :],
                                w_ref[i].astype(matmul_dtype),
                                preferred_element_type=jnp.float32)

        acc = jnp.maximum(acc + b_ref[...], 0.0)              # bias + ReLU (f32)
        acc = acc.reshape(batch, s_pad, nc)                   # aligned: s_pad%8==0

        # Per-branch valid length mask (invalid positions read zero padding /
        # cross-batch rows). Post-ReLU values are >= 0, so fill with 0.0.
        pos = jax.lax.broadcasted_iota(jnp.int32, (s_pad, nc), 0)
        ch = jax.lax.broadcasted_iota(jnp.int32, (s_pad, nc), 1)
        lvalid = jnp.full((s_pad, nc), seq_len - fhs[0] + 1, jnp.int32)
        for f in range(1, n_f):
            lvalid = jnp.where(ch >= f * out_chs, seq_len - fhs[f] + 1, lvalid)
        acc = jnp.where((pos < lvalid)[None, :, :], acc, 0.0)

        pooled = jnp.max(acc, axis=1)                         # (B, NC)

        # Dropout(0.5) is identity at inference.
        # TODO(synk): training-mode dropout (pltpu.prng_*) not implemented.
        logits = jnp.dot(pooled, fcw_ref[...],
                         preferred_element_type=jnp.float32) + fcb_ref[...]
        o_ref[...] = jax.nn.sigmoid(logits).astype(o_ref.dtype)

    return kernel


# ----------------------------------------------------------------------------
# Parameter preparation (hoisted out of the per-call forward pass)
# ----------------------------------------------------------------------------
def prepare_params(conv_ws, conv_bs, fc1_w, fc1_b, out_chs, filter_heights):
    """Pack all conv branches into one (max_fh, E, n_f*C) weight tensor."""
    n_f = len(conv_ws)
    max_fh = max(filter_heights)
    E = conv_ws[0].shape[-1]
    nc = n_f * out_chs
    w_packed = jnp.zeros((max_fh, E, nc), jnp.float32)
    for f, (fh, w) in enumerate(zip(filter_heights, conv_ws)):
        w_t = jnp.transpose(w[:, 0, :, :], (1, 2, 0))          # (fh, E, C)
        w_packed = w_packed.at[:fh, :, f * out_chs:(f + 1) * out_chs].set(w_t)
    b_packed = jnp.concatenate(conv_bs, axis=0).reshape(1, nc)  # (1, NC)
    fc_w_packed = fc1_w.reshape(nc, 1)                          # (NC, 1)
    fc_b_packed = fc1_b.reshape(1, 1)                           # (1, 1)
    return w_packed, b_packed, fc_w_packed, fc_b_packed


def init_params(key, vocab_size, embd_size, out_chs, filter_heights):
    """Deterministic parameter init mirroring the PyTorch module's shapes."""
    keys = jax.random.split(key, 2 + 2 * len(filter_heights) + 2)
    params = {}
    # nn.Embedding(vocab_size, embd_size): N(0, 1)
    params["embedding"] = jax.random.normal(keys[0], (vocab_size, embd_size),
                                            jnp.float32)
    # nn.Conv2d(1, out_chs, (fh, embd_size)): U(-1/sqrt(fan_in), 1/sqrt(fan_in))
    convs = []
    for i, fh in enumerate(filter_heights):
        fan_in = 1 * fh * embd_size
        bound = 1.0 / (fan_in ** 0.5)
        w = jax.random.uniform(keys[1 + 2 * i], (out_chs, 1, fh, embd_size),
                               jnp.float32, -bound, bound)
        b = jax.random.uniform(keys[2 + 2 * i], (out_chs,),
                               jnp.float32, -bound, bound)
        convs.append((w, b))
    params["convs"] = convs
    # nn.Linear(out_chs * len(filter_heights), 1)
    feat = out_chs * len(filter_heights)
    bound = 1.0 / (feat ** 0.5)
    params["fc1_w"] = jax.random.uniform(keys[-2], (1, feat),
                                         jnp.float32, -bound, bound)
    params["fc1_b"] = jax.random.uniform(keys[-1], (1,),
                                         jnp.float32, -bound, bound)
    return params


# ----------------------------------------------------------------------------
# Forward pass
# ----------------------------------------------------------------------------
@functools.partial(jax.jit, static_argnames=("filter_heights", "out_chs",
                                             "matmul_dtype"))
def net_forward(tokens, embedding, w_packed, b_packed, fc_w_packed,
                fc_b_packed, *, filter_heights, out_chs,
                matmul_dtype=jnp.float32):
    """Forward pass of Net. tokens: (B, S) int32 -> probs: (B, 1) float32."""
    B, S = tokens.shape
    E = embedding.shape[1]
    max_fh = max(filter_heights)
    if S < max_fh:
        raise ValueError(f"sequence length {S} < largest filter height {max_fh}")

    s_pad = _round_up(S, 8)                         # aligned per-batch segment
    rows = B * s_pad
    rows_padded = _round_up(rows + max_fh - 1, 8)   # tail for shifted slices

    # Embedding lookup (gather) is glue left to XLA; padded + flattened so the
    # kernel DMAs the embedding slab exactly once, lane-dense along E.
    emb = jnp.take(embedding, tokens, axis=0)                  # (B, S, E)
    emb = jnp.pad(emb, ((0, 0), (0, s_pad - S), (0, 0)))
    emb = emb.reshape(rows, E)
    emb = jnp.pad(emb, ((0, rows_padded - rows), (0, 0)))
    emb = emb.astype(matmul_dtype)   # bf16 halves the dominant DMA on v6e/v7x

    kernel = _make_fused_kernel(filter_heights, out_chs, B, S, s_pad,
                                matmul_dtype)
    # Whole problem fits comfortably in VMEM -> single invocation, no grid.
    # TODO(synk): for large B add a batch grid axis with
    # dimension_semantics=("parallel",) (v7x second TensorCore) and size blocks
    # for ~32 MiB usable VMEM.
    probs = pl.pallas_call(
        kernel,
        out_shape=jax.ShapeDtypeStruct((B, 1), jnp.float32),
        in_specs=[_VMEM] * 5,
        out_specs=_VMEM,
    )(emb, w_packed, b_packed, fc_w_packed, fc_b_packed)
    return probs


# ----------------------------------------------------------------------------
# Pure-JAX reference (mirrors the PyTorch forward) for a sanity check
# ----------------------------------------------------------------------------
def _reference_forward(tokens, embedding, conv_ws, conv_bs, fc1_w, fc1_b,
                       filter_heights):
    emb = jnp.take(embedding, tokens, axis=0)                  # (B, S, E)
    B, S, E = emb.shape
    pooled = []
    for fh, w, b in zip(filter_heights, conv_ws, conv_bs):
        C = w.shape[0]
        L = S - fh + 1
        win = jnp.stack([emb[:, i:i + L, :] for i in range(fh)], axis=2)
        win = win.reshape(B, L, fh * E)
        s = jnp.einsum("blk,ck->blc", win, w.reshape(C, fh * E)) + b
        pooled.append(jnp.max(jax.nn.relu(s), axis=1))
    feats = jnp.concatenate(pooled, axis=1)
    return jax.nn.sigmoid(feats @ fc1_w.T + fc1_b)


# ----------------------------------------------------------------------------
# Demo
# ----------------------------------------------------------------------------
if __name__ == "__main__":
    VOCAB_SIZE = 50
    EMBD_SIZE = 64            # embd_size from the source
    OUT_CHS = 8
    FILTER_HEIGHTS = (3, 4, 5)
    B, S = 2, 16

    key = jax.random.PRNGKey(0)
    pkey, xkey = jax.random.split(key)
    params = init_params(pkey, VOCAB_SIZE, EMBD_SIZE, OUT_CHS, FILTER_HEIGHTS)
    tokens = jax.random.randint(xkey, (B, S), 0, VOCAB_SIZE, dtype=jnp.int32)

    conv_ws = tuple(w for w, _ in params["convs"])
    conv_bs = tuple(b for _, b in params["convs"])
    w_packed, b_packed, fc_w_packed, fc_b_packed = prepare_params(
        conv_ws, conv_bs, params["fc1_w"], params["fc1_b"], OUT_CHS,
        FILTER_HEIGHTS)

    probs = net_forward(tokens, params["embedding"], w_packed, b_packed,
                        fc_w_packed, fc_b_packed,
                        filter_heights=FILTER_HEIGHTS, out_chs=OUT_CHS)
    probs = jax.block_until_ready(probs)

    ref = _reference_forward(tokens, params["embedding"], conv_ws, conv_bs,
                             params["fc1_w"], params["fc1_b"], FILTER_HEIGHTS)
    ref = jax.block_until_ready(ref)

    assert probs.shape == (B, 1)
    assert bool(jnp.all(jnp.isfinite(probs)))
    assert bool(jnp.all((probs >= 0.0) & (probs <= 1.0)))
    assert bool(jnp.allclose(probs, ref, atol=2e-2)), (probs, ref)
    print("KERNEL_OK")
</pallas_src>

<mosaic_0001>
module attributes {stable_mosaic.version = 11 : i64} {
  func.func @kernel(%arg0: memref<40x64xf32, #tpu.memory_space<vmem>>, %arg1: memref<5x64x24xf32, #tpu.memory_space<vmem>>, %arg2: memref<1x24xf32, #tpu.memory_space<vmem>>, %arg3: memref<24x1xf32, #tpu.memory_space<vmem>>, %arg4: memref<1x1xf32, #tpu.memory_space<vmem>>, %arg5: memref<2x1xf32, #tpu.memory_space<vmem>>) attributes {dimension_semantics = [], scalar_prefetch = 0 : i64, scratch_operands = 0 : i64, tpu.core_type = #tpu.core_type<tc>} {
    %c0 = arith.constant 0 : index
    %c0_0 = arith.constant 0 : index
    %0 = vector.load %arg0[%c0, %c0_0] : memref<40x64xf32, #tpu.memory_space<vmem>>, vector<40x64xf32>
    %cst = arith.constant 0.000000e+00 : f32
    %1 = vector.broadcast %cst : f32 to vector<32x24xf32>
    %2 = vector.extract_strided_slice %0 {offsets = [0, 0], sizes = [32, 64], strides = [1, 1]} : vector<40x64xf32> to vector<32x64xf32>
    %c0_1 = arith.constant 0 : index
    %c0_2 = arith.constant 0 : index
    %c0_3 = arith.constant 0 : index
    %3 = vector.load %arg1[%c0_1, %c0_2, %c0_3] : memref<5x64x24xf32, #tpu.memory_space<vmem>>, vector<1x64x24xf32>
    %4 = vector.shape_cast %3 : vector<1x64x24xf32> to vector<64x24xf32>
    %cst_4 = arith.constant dense<0.000000e+00> : vector<32x24xf32>
    %5 = tpu.matmul %2, %4, %cst_4 {dimension_numbers = #tpu.dot_dimension_numbers<[1], [0], [0], [1], [0, 0, 1, 1], [], []>} : vector<32x64xf32>, vector<64x24xf32>, vector<32x24xf32> -> vector<32x24xf32>
    %6 = arith.addf %1, %5 : vector<32x24xf32>
    %7 = vector.extract_strided_slice %0 {offsets = [1, 0], sizes = [32, 64], strides = [1, 1]} : vector<40x64xf32> to vector<32x64xf32>
    %c1 = arith.constant 1 : index
    %c0_5 = arith.constant 0 : index
    %c0_6 = arith.constant 0 : index
    %8 = vector.load %arg1[%c1, %c0_5, %c0_6] : memref<5x64x24xf32, #tpu.memory_space<vmem>>, vector<1x64x24xf32>
    %9 = vector.shape_cast %8 : vector<1x64x24xf32> to vector<64x24xf32>
    %cst_7 = arith.constant dense<0.000000e+00> : vector<32x24xf32>
    %10 = tpu.matmul %7, %9, %cst_7 {dimension_numbers = #tpu.dot_dimension_numbers<[1], [0], [0], [1], [0, 0, 1, 1], [], []>} : vector<32x64xf32>, vector<64x24xf32>, vector<32x24xf32> -> vector<32x24xf32>
    %11 = arith.addf %6, %10 : vector<32x24xf32>
    %12 = vector.extract_strided_slice %0 {offsets = [2, 0], sizes = [32, 64], strides = [1, 1]} : vector<40x64xf32> to vector<32x64xf32>
    %c2 = arith.constant 2 : index
    %c0_8 = arith.constant 0 : index
    %c0_9 = arith.constant 0 : index
    %13 = vector.load %arg1[%c2, %c0_8, %c0_9] : memref<5x64x24xf32, #tpu.memory_space<vmem>>, vector<1x64x24xf32>
    %14 = vector.shape_cast %13 : vector<1x64x24xf32> to vector<64x24xf32>
    %cst_10 = arith.constant dense<0.000000e+00> : vector<32x24xf32>
    %15 = tpu.matmul %12, %14, %cst_10 {dimension_numbers = #tpu.dot_dimension_numbers<[1], [0], [0], [1], [0, 0, 1, 1], [], []>} : vector<32x64xf32>, vector<64x24xf32>, vector<32x24xf32> -> vector<32x24xf32>
    %16 = arith.addf %11, %15 : vector<32x24xf32>
    %17 = vector.extract_strided_slice %0 {offsets = [3, 0], sizes = [32, 64], strides = [1, 1]} : vector<40x64xf32> to vector<32x64xf32>
    %c3 = arith.constant 3 : index
    %c0_11 = arith.constant 0 : index
    %c0_12 = arith.constant 0 : index
    %18 = vector.load %arg1[%c3, %c0_11, %c0_12] : memref<5x64x24xf32, #tpu.memory_space<vmem>>, vector<1x64x24xf32>
    %19 = vector.shape_cast %18 : vector<1x64x24xf32> to vector<64x24xf32>
    %cst_13 = arith.constant dense<0.000000e+00> : vector<32x24xf32>
    %20 = tpu.matmul %17, %19, %cst_13 {dimension_numbers = #tpu.dot_dimension_numbers<[1], [0], [0], [1], [0, 0, 1, 1], [], []>} : vector<32x64xf32>, vector<64x24xf32>, vector<32x24xf32> -> vector<32x24xf32>
    %21 = arith.addf %16, %20 : vector<32x24xf32>
    %22 = vector.extract_strided_slice %0 {offsets = [4, 0], sizes = [32, 64], strides = [1, 1]} : vector<40x64xf32> to vector<32x64xf32>
    %c4 = arith.constant 4 : index
    %c0_14 = arith.constant 0 : index
    %c0_15 = arith.constant 0 : index
    %23 = vector.load %arg1[%c4, %c0_14, %c0_15] : memref<5x64x24xf32, #tpu.memory_space<vmem>>, vector<1x64x24xf32>
    %24 = vector.shape_cast %23 : vector<1x64x24xf32> to vector<64x24xf32>
    %cst_16 = arith.constant dense<0.000000e+00> : vector<32x24xf32>
    %25 = tpu.matmul %22, %24, %cst_16 {dimension_numbers = #tpu.dot_dimension_numbers<[1], [0], [0], [1], [0, 0, 1, 1], [], []>} : vector<32x64xf32>, vector<64x24xf32>, vector<32x24xf32> -> vector<32x24xf32>
    %26 = arith.addf %21, %25 : vector<32x24xf32>
    %c0_17 = arith.constant 0 : index
    %c0_18 = arith.constant 0 : index
    %27 = vector.load %arg2[%c0_17, %c0_18] : memref<1x24xf32, #tpu.memory_space<vmem>>, vector<1x24xf32>
    %28 = vector.broadcast %27 : vector<1x24xf32> to vector<32x24xf32>
    %29 = arith.addf %26, %28 : vector<32x24xf32>
    %cst_19 = arith.constant 0.000000e+00 : f32
    %30 = vector.broadcast %cst_19 : f32 to vector<32x24xf32>
    %31 = arith.maximumf %29, %30 : vector<32x24xf32>
    %32 = vector.shape_cast %31 : vector<32x24xf32> to vector<2x16x24xf32>
    %33 = tpu.iota {dimensions = array<i32: 0>} : vector<16x24xi32>
    %34 = tpu.iota {dimensions = array<i32: 1>} : vector<16x24xi32>
    %c14_i32 = arith.constant 14 : i32
    %35 = vector.broadcast %c14_i32 : i32 to vector<16x24xi32>
    %c8_i32 = arith.constant 8 : i32
    %36 = vector.broadcast %c8_i32 : i32 to vector<16x24xi32>
    %37 = arith.cmpi sge, %34, %36 : vector<16x24xi32>
    %c13_i32 = arith.constant 13 : i32
    %38 = vector.broadcast %c13_i32 : i32 to vector<16x24xi32>
    %39 = arith.select %37, %38, %35 : vector<16x24xi1>, vector<16x24xi32>
    %c16_i32 = arith.constant 16 : i32
    %40 = vector.broadcast %c16_i32 : i32 to vector<16x24xi32>
    %41 = arith.cmpi sge, %34, %40 : vector<16x24xi32>
    %c12_i32 = arith.constant 12 : i32
    %42 = vector.broadcast %c12_i32 : i32 to vector<16x24xi32>
    %43 = arith.select %41, %42, %39 : vector<16x24xi1>, vector<16x24xi32>
    %44 = arith.cmpi slt, %33, %43 : vector<16x24xi32>
    %45 = vector.shape_cast %44 : vector<16x24xi1> to vector<1x16x24xi1>
    %cst_20 = arith.constant 0.000000e+00 : f32
    %46 = vector.shape_cast %45 : vector<1x16x24xi1> to vector<1x16x24xi1>
    %47 = vector.broadcast %46 : vector<1x16x24xi1> to vector<2x16x24xi1>
    %48 = vector.broadcast %cst_20 : f32 to vector<2x16x24xf32>
    %49 = arith.select %47, %32, %48 : vector<2x16x24xi1>, vector<2x16x24xf32>
    %cst_21 = arith.constant dense<0xFF800000> : vector<2x24xf32>
    %50 = vector.multi_reduction <maximumf>, %49, %cst_21 [1] : vector<2x16x24xf32> to vector<2x24xf32>
    %c0_22 = arith.constant 0 : index
    %c0_23 = arith.constant 0 : index
    %51 = vector.load %arg3[%c0_22, %c0_23] : memref<24x1xf32, #tpu.memory_space<vmem>>, vector<24x1xf32>
    %cst_24 = arith.constant dense<0.000000e+00> : vector<2x1xf32>
    %52 = tpu.matmul %50, %51, %cst_24 {dimension_numbers = #tpu.dot_dimension_numbers<[1], [0], [0], [1], [0, 0, 1, 1], [], []>} : vector<2x24xf32>, vector<24x1xf32>, vector<2x1xf32> -> vector<2x1xf32>
    %c0_25 = arith.constant 0 : index
    %c0_26 = arith.constant 0 : index
    %53 = vector.load %arg4[%c0_25, %c0_26] : memref<1x1xf32, #tpu.memory_space<vmem>>, vector<1x1xf32>
    %54 = vector.broadcast %53 : vector<1x1xf32> to vector<2x1xf32>
    %55 = arith.addf %52, %54 : vector<2x1xf32>
    %56 = arith.negf %55 : vector<2x1xf32>
    %57 = math.exp %56 : vector<2x1xf32>
    %cst_27 = arith.constant 1.000000e+00 : f32
    %58 = vector.broadcast %cst_27 : f32 to vector<2x1xf32>
    %59 = arith.addf %58, %57 : vector<2x1xf32>
    %60 = arith.divf %58, %59 : vector<2x1xf32>
    %c0_28 = arith.constant 0 : index
    %c0_29 = arith.constant 0 : index
    %61 = vector.load %arg5[%c0_28, %c0_29] : memref<2x1xf32, #tpu.memory_space<vmem>>, vector<2x1xf32>
    tpu.vector_store %arg5[%c0_28, %c0_29], %60 {strides = array<i32>} : memref<2x1xf32, #tpu.memory_space<vmem>>, vector<2x1xf32>,
    return
  }
}

</mosaic_0001>

<bundles_post_ra>
// kernel: net_forward.1
= control target key start
LH: loop header
LB: loop body
LE: loop exit
PB: predicated region body
PF: predicated region fallthrough
CT: control target
= control target key end

     0   :  { %vm49_vm0 = vcmask 1046528   ;;  %vm255_vm1 = vcmask 1045504   ;;  %vm59_vm2 = vcmask 523264   ;;  %vm371_vm3 = vcmask 1044480   ;;  %s1355_s1 = inlined_call_operand.vmem [shape: f32[5,64,24], index: 1, kind: input, shape index: {}]   ;;  %s1356_s0 = inlined_call_operand.vmem [shape: f32[40,64], index: 0, kind: input, shape index: {}]   ;;  %s1357_s3 = inlined_call_operand.vmem [shape: f32[24,1], index: 3, kind: input, shape index: {}]   ;;  %s1358_s4 = inlined_call_operand.<no memory space> [shape: f32[1,1], index: 4, kind: input, shape index: {}]   ;;  %s1359_s2 = inlined_call_operand.vmem [shape: f32[1,24], index: 2, kind: input, shape index: {}]   ;;  %s1360_s5 = inlined_call_operand.vmem [shape: f32[2,1], index: 5, kind: output, shape index: {}]  }
   0x1   :  { %v745_v0 = vld [vmem:[%s1355_s1 + $0x40] sm:$0xff]  ;;  %v746_v1 = vld [vmem:[%s1355_s1 + $0x48] sm:$0xff]  ;;  %v747_v5 = vld [vmem:[%s1355_s1 + $0x50] sm:$0xff]  ;;  %vm487_vm4 = vcmask 1043456   ;;  %vm1093_vm5 = vmmov 0   ;;  %vm628_vm9 = vcmask 195584  }
   0x2   :  { %v761_v2 = vld [vmem:[%s1355_s1 + $0x80] sm:$0xff]  ;;  %v984_v3 = vpack.c.bf16 %v746_v1, %v745_v0  ;;  %v762_v4 = vld [vmem:[%s1355_s1 + $0x88] sm:$0xff]  ;;  %v748_v6 = vld [vmem:[%s1355_s1 + $0x58] sm:$0xff]  ;;  %vm659_vm10 = vcmask 1041409   ;;  %vm739_vm11 = vcmask 1024  }
   0x3   :  { %v1016_v7 = vpack.c.bf16 %v762_v4, %v761_v2  ;;  %v988_v8 = vpack.c.bf16 %v748_v6, %v747_v5  ;;  %v763_v9 = vld [vmem:[%s1355_s1 + $0x90] sm:$0xff]  ;;  %v764_v10 = vld [vmem:[%s1355_s1 + $0x98] sm:$0xff]  ;;  %v749_v11 = vld [vmem:[%s1355_s1 + $0x60] sm:$0xff] }
   0x4   :  { %985 = vmatprep.subr.bf16.mxu1 %v984_v3  ;;  %v1020_v12 = vpack.c.bf16 %v764_v10, %v763_v9  ;;  %v750_v13 = vld [vmem:[%s1355_s1 + $0x68] sm:$0xff]  ;;  %v765_v14 = vld [vmem:[%s1355_s1 + $0xa0] sm:$0xff]  ;;  %v751_v20 = vld [vmem:[%s1355_s1 + $0x70] sm:$0xff] }
   0x5   :  { %v766_v15 = vld [vmem:[%s1355_s1 + $0xa8] sm:$0xff]  ;;  %1017 = vmatprep.subr.bf16.mxu0 %v1016_v7  ;;  %987 = vmatpush3.bf16.msra.mxu1 %v984_v3  ;;  %v992_v16 = vpack.c.bf16 %v750_v13, %v749_v11  ;;  %v1164_v17 = vld [vmem:[%s1356_s0] sm:$0xff]  ;;  %v752_v21 = vld [vmem:[%s1355_s1 + $0x78] sm:$0xff] }
   0x6   :  { %1019 = vmatpush3.bf16.msra.mxu0 %v1016_v7  ;;  %989 = vmatprep.subr.bf16.mxu1 %v988_v8  ;;  %v1169_v18 = vld [vmem:[%s1356_s0 + $0x8] sm:$0xff]  ;;  %v1024_v19 = vpack.c.bf16 %v766_v15, %v765_v14  ;;  %v50_v22 = vrot.slane %v1164_v17, 1  ;;  %v256_v24 = vrot.slane %v1164_v17, 2  ;;  %v767_v25 = vld [vmem:[%s1355_s1 + $0xb0] sm:$0xff]  ;;  %v768_v26 = vld [vmem:[%s1355_s1 + $0xb8] sm:$0xff]  ;;  %v996_v29 = vpack.c.bf16 %v752_v21, %v751_v20 }
   0x7   :  { %1021 = vmatprep.subr.bf16.mxu0 %v1020_v12  ;;  %v51_v23 = vrot.slane %v1169_v18, 1  ;;  %v257_v27 = vrot.slane %v1169_v18, 2  ;;  %v1192_v31 = vld [vmem:[%s1356_s0 + $0x10] sm:$0xff]  ;;  %v1028_v32 = vpack.c.bf16 %v768_v26, %v767_v25  ;;  %v27_v33 = vld [vmem:[%s1355_s1] sm:$0xff]  ;;  %v28_v34 = vld [vmem:[%s1355_s1 + $0x8] sm:$0xff]  ;;  %v372_v62 = vrot.slane %v1164_v17, 3 }
   0x8   :  { %v773_v35 = vld [vmem:[%s1355_s1 + $0xc0] sm:$0xff]  ;;  %v774_v36 = vld [vmem:[%s1355_s1 + $0xc8] sm:$0xff]  ;;  %v53_v37 = vrot.slane %v1192_v31, 1  ;;  %v1212_v38 = vld [vmem:[%s1356_s0 + $0x18] sm:$0xff]  ;;  %v1000_v39 = vpack.c.bf16 %v28_v34, %v27_v33  ;;  %v259_v40 = vrot.slane %v1192_v31, 2  ;;  %v373_v63 = vrot.slane %v1169_v18, 3 }
   0x9   :  { %991 = vmatpush3.bf16.msra.mxu1 %v988_v8  ;;  %v52_v28 = vsel %vm49_vm0, %v50_v22, %v51_v23  ;;  %v258_v30 = vsel %vm255_vm1, %v256_v24, %v257_v27  ;;  %v1218_v41 = vld [vmem:[%s1356_s0 + $0x20] sm:$0xff]  ;;  %v1032_v42 = vpack.c.bf16 %v774_v36, %v773_v35  ;;  %v29_v43 = vld [vmem:[%s1355_s1 + $0x10] sm:$0xff]  ;;  %v30_v44 = vld [vmem:[%s1355_s1 + $0x18] sm:$0xff]  ;;  %v55_v47 = vrot.slane %v1212_v38, 1 }
   0xa   :  { %1023 = vmatpush3.bf16.msra.mxu0 %v1020_v12  ;;  %993 = vmatprep.subr.bf16.mxu1 %v992_v16  ;;  %v775_v45 = vld [vmem:[%s1355_s1 + $0xd0] sm:$0xff]  ;;  %v776_v46 = vld [vmem:[%s1355_s1 + $0xd8] sm:$0xff]  ;;  %v54_v48 = vsel %vm49_vm0, %v51_v23, %v53_v37  ;;  %v57_v49 = vrot.slane %v1218_v41, 1  ;;  %v261_v50 = vrot.slane %v1212_v38, 2  ;;  %v260_v51 = vsel %vm255_vm1, %v257_v27, %v259_v40  ;;  %v31_v55 = vld [vmem:[%s1355_s1 + $0x20] sm:$0xff] }
   0xb   :  { %1025 = vmatprep.subr.bf16.mxu0 %v1024_v19  ;;  %881 = vmatprep.mubr.msk.f32.mxu1 %vm59_vm2, %v52_v28  ;;  %v1004_v52 = vpack.c.bf16 %v30_v44, %v29_v43  ;;  %v263_v53 = vrot.slane %v1218_v41, 2  ;;  %v1036_v54 = vpack.c.bf16 %v776_v46, %v775_v45  ;;  %v32_v56 = vld [vmem:[%s1355_s1 + $0x28] sm:$0xff]  ;;  %v777_v57 = vld [vmem:[%s1355_s1 + $0xe0] sm:$0xff]  ;;  %v56_v59 = vsel %vm49_vm0, %v53_v37, %v55_v47  ;;  %v33_v3 = vld [vmem:[%s1355_s1 + $0x30] sm:$0xff] }
   0xc   :  { %925 = vmatprep.mubr.msk.f32.mxu0 %vm59_vm2, %v258_v30  ;;  %v778_v58 = vld [vmem:[%s1355_s1 + $0xe8] sm:$0xff]  ;;  %v58_v60 = vsel %vm49_vm0, %v55_v47, %v57_v49  ;;  %v262_v61 = vsel %vm255_vm1, %v259_v40, %v261_v50  ;;  %v1008_v0 = vpack.c.bf16 %v32_v56, %v31_v55  ;;  %v34_v4 = vld [vmem:[%s1355_s1 + $0x38] sm:$0xff]  ;;  %v779_v5 = vld [vmem:[%s1355_s1 + $0xf0] sm:$0xff]  ;;  %v374_v7 = vsel %vm371_vm3, %v372_v62, %v373_v63 }
   0xd   :  { %995 = vmatpush3.bf16.msra.mxu1 %v992_v16  ;;  %v264_v1 = vsel %vm255_vm1, %v261_v50, %v263_v53  ;;  %v1040_v2 = vpack.c.bf16 %v778_v58, %v777_v57  ;;  %v780_v6 = vld [vmem:[%s1355_s1 + $0xf8] sm:$0xff]  ;;  %v1012_v8 = vpack.c.bf16 %v34_v4, %v33_v3  ;;  %v785_v10 = vld [vmem:[%s1355_s1 + $0x100] sm:$0xff]  ;;  %v786_v11 = vld [vmem:[%s1355_s1 + $0x108] sm:$0xff]  ;;  %v375_v12 = vrot.slane %v1192_v31, 3 }
   0xe   :  { %1027 = vmatpush3.bf16.msra.mxu0 %v1024_v19  ;;  %997 = vmatprep.subr.bf16.mxu1 %v996_v29  ;;  %v1044_v9 = vpack.c.bf16 %v780_v6, %v779_v5  ;;  %v1048_v13 = vpack.c.bf16 %v786_v11, %v785_v10  ;;  %v377_v14 = vrot.slane %v1212_v38, 3  ;;  %v787_v15 = vld [vmem:[%s1355_s1 + $0x110] sm:$0xff]  ;;  %v788_v16 = vld [vmem:[%s1355_s1 + $0x118] sm:$0xff]  ;;  %v379_v20 = vrot.slane %v1218_v41, 3  ;;  %v789_v25 = vld [vmem:[%s1355_s1 + $0x120] sm:$0xff] }
   0xf   :  { %1029 = vmatprep.subr.bf16.mxu0 %v1028_v32  ;;  %v376_v19 = vsel %vm371_vm3, %v373_v63, %v375_v12  ;;  %v1052_v21 = vpack.c.bf16 %v788_v16, %v787_v15  ;;  %v488_v23 = vrot.slane %v1164_v17, 4  ;;  %v489_v24 = vrot.slane %v1169_v18, 4  ;;  %v790_v26 = vld [vmem:[%s1355_s1 + $0x128] sm:$0xff]  ;;  %v791_v28 = vld [vmem:[%s1355_s1 + $0x130] sm:$0xff] }
  0x10   :  { %v378_v22 = vsel %vm371_vm3, %v375_v12, %v377_v14  ;;  %v493_v33 = vrot.slane %v1212_v38, 4  ;;  %v495_v35 = vrot.slane %v1218_v41, 4  ;;  %v1091_v40 = vmov 0.0|0.0   ;;  %v649_v41 = vld [vmem:[%s1357_s3 + $0x10] sm:$0xff] }
  0x11   :  { %999 = vmatpush3.bf16.msra.mxu1 %v996_v29  ;;  %v490_v27 = vsel %vm487_vm4, %v488_v23, %v489_v24  ;;  %v792_v29 = vld [vmem:[%s1355_s1 + $0x138] sm:$0xff]  ;;  %v10_v43 = vstv %s1358_s4  ;;  %v609_v47 = vlaneseq }
  0x12   :  { %1031 = vmatpush3.bf16.msra.mxu0 %v1028_v32  ;;  %1001 = vmatprep.subr.bf16.mxu1 %v1000_v39  ;;  %v1060_v30 = vpack.c.bf16 %v792_v29, %v791_v28  ;;  %v491_v32 = vrot.slane %v1192_v31, 4  ;;  %v496_v37 = vsel %vm487_vm4, %v493_v33, %v495_v35  ;;  %11 = vst [vmem:[#allocation2] sm:$0x1] %v10_v43 }
  0x13   :  { %1033 = vmatprep.subr.bf16.mxu0 %v1032_v42  ;;  %v613_v49 = vand.u32 127, %v609_v47  ;;  %v610_v50 = vshrl.u32 %v609_v47, 7 }
  0x14   :  { %882 = vmatmul.mubr.msk.f32.vlgmr.msra.gmra.mrb[0].mxu1 %vm59_vm2, %v54_v48  ;;  %v492_v34 = vsel %vm487_vm4, %v489_v24, %v491_v32  ;;  %v494_v36 = vsel %vm487_vm4, %v491_v32, %v493_v33 }
  0x15   :  { %1003 = vmatpush3.bf16.msra.mxu1 %v1000_v39  ;;  %926 = vmatmul.mubr.msk.f32.vlgmr.msra.gmra.mrb[0].mxu0 %vm59_vm2, %v260_v51  ;;  %vm614_vm6 = vcmp.ge.s32.totalorder %v613_v49, 8  ;;  %v1094_v51 = vmov 14   ;;  %vm616_vm7 = vcmp.ge.s32.totalorder %v613_v49, 16  ;;  %v611_v55 = vadd.s32 8, %v610_v50 }
  0x16   :  { %1035 = vmatpush3.bf16.msra.mxu0 %v1032_v42  ;;  %1005 = vmatprep.subr.bf16.mxu1 %v1004_v52  ;;  %v1092_v42 = vmov 0.0  }
  0x17   :  { %1037 = vmatprep.subr.bf16.mxu0 %v1036_v54  ;;  %884 = vmatprep.mubr.msk.f32.mxu1 %vm59_vm2, %v56_v59 }
  0x18   :  { %885 = vmatmul.mubr.msk.f32.gmra.mrb[2].mxu1 %vm59_vm2, %v58_v60  ;;  %928 = vmatprep.mubr.msk.f32.mxu0 %vm59_vm2, %v262_v61 }
  0x19   :  { %1007 = vmatpush3.bf16.msra.mxu1 %v1004_v52  ;;  %929 = vmatmul.mubr.msk.f32.gmra.mrb[2].mxu0 %vm59_vm2, %v264_v1  ;;  %v615_v52 = vsel %vm614_vm6, 13, %v1094_v51  ;;  %v798_v29 = vld [vmem:[#allocation2] ss:$0 sm:$0xff] }
  0x1a   :  { %1039 = vmatpush3.bf16.msra.mxu0 %v1036_v54  ;;  %1009 = vmatprep.subr.bf16.mxu1 %v1008_v0  ;;  %v797_v54 = vld [vmem:[%s1359_s2] ss:$0 sm:$0xff]  ;;  %v617_v57 = vsel %vm616_vm7, 12, %v615_v52 }
  0x1b   :  { %1041 = vmatprep.subr.bf16.mxu0 %v1040_v2  ;;  %903 = vmatprep.mubr.msk.f32.mxu1 %vm59_vm2, %v1164_v17  ;;  %v380_v17 = vsel %vm371_vm3, %v377_v14, %v379_v20  ;;  %vm619_vm8 = vcmp.lt.s32.totalorder %v611_v55, %v617_v57 }
  0x1c   :  { %947 = vmatprep.mubr.msk.f32.mxu0 %vm59_vm2, %v374_v7 }
  0x1d   :  { %1011 = vmatpush3.bf16.msra.mxu1 %v1008_v0 }
  0x1e   :  { %1043 = vmatpush3.bf16.msra.mxu0 %v1040_v2  ;;  %1013 = vmatprep.subr.bf16.mxu1 %v1012_v8 }
  0x1f   :  { %1045 = vmatprep.subr.bf16.mxu0 %v1044_v9 }
  0x21   :  { %1015 = vmatpush3.bf16.msra.mxu1 %v1012_v8 }
  0x22   :  { %1047 = vmatpush3.bf16.msra.mxu0 %v1044_v9  ;;  %1064 = vmatprep.subr.bf16.mxu1 %v1091_v40 }
  0x23   :  { %1049 = vmatprep.subr.bf16.mxu0 %v1048_v13 }
  0x24   :  { %904 = vmatmul.mubr.msk.f32.vlgmr.msra.gmra.mrb[0].mxu1 %vm59_vm2, %v1169_v18  ;;  %v1056_v18 = vpack.c.bf16 %v790_v26, %v789_v25 }
  0x25   :  { %948 = vmatmul.mubr.msk.f32.vlgmr.msra.gmra.mrb[0].mxu0 %vm59_vm2, %v376_v19  ;;  %906 = vmatprep.mubr.msk.f32.mxu1 %vm59_vm2, %v1192_v31  ;;  %v647_v31 = vld [vmem:[%s1357_s3] sm:$0xff] }
  0x26   :  { %1051 = vmatpush3.bf16.msra.mxu0 %v1048_v13  ;;  %950 = vmatprep.mubr.msk.f32.mxu0 %vm59_vm2, %v378_v22 }
  0x27   :  { %1053 = vmatprep.subr.bf16.mxu0 %v1052_v21 }
  0x28   :  { %907 = vmatmul.mubr.msk.f32.gmra.mrb[2].mxu1 %vm59_vm2, %v1212_v38  ;;  %v648_v38 = vld [vmem:[%s1357_s3 + $0x8] sm:$0xff] }
  0x29   :  { %951 = vmatmul.mubr.msk.f32.gmra.mrb[2].mxu0 %vm59_vm2, %v380_v17  ;;  %v1065_v39 = vpack.c.bf16 %v648_v38, %v647_v31  ;;  %981 = vmatprep.mubr.msk.f32.mxu1 %vm1093_vm5, %v1092_v42 }
  0x2a   :  { %1055 = vmatpush3.bf16.msra.mxu0 %v1052_v21  ;;  %969 = vmatprep.mubr.msk.f32.mxu0 %vm59_vm2, %v490_v27 }
  0x2b   :  { %1057 = vmatprep.subr.bf16.mxu0 %v1056_v18  ;;  %1066 = vmatpush3.bf16.msra.mxu1 %v1065_v39 }
  0x2c   :  { %979 = vmatprep.subr.mxu1 %v1092_v42 }
  0x2e   :  { %1059 = vmatpush3.bf16.msra.mxu0 %v1056_v18 }
  0x2f   :  { %1061 = vmatprep.subr.bf16.mxu0 %v1060_v30  ;;  %980 = vmatpush3.msra.mxu1 %v649_v41 }
  0x32   :  { %1063 = vmatpush3.bf16.msra.mxu0 %v1060_v30 }
  0x35   :  { %970 = vmatmul.mubr.msk.f32.vlgmr.msra.gmra.mrb[0].mxu0 %vm59_vm2, %v492_v34 }
  0x36   :  { %972 = vmatprep.mubr.msk.f32.mxu0 %vm59_vm2, %v494_v36 }
  0x39   :  { %973 = vmatmul.mubr.msk.f32.gmra.mrb[2].mxu0 %vm59_vm2, %v496_v37 }
  0xf7   :  { %v905_v44 = vpop.f32.mrb[0].mxu1 }
  0xf8   :  { %v227_v45 = vpop.f32.mrb[1].mxu1 }
  0xfb   :  { %v908_v46 = vpop.f32.mrb[2].mxu1 }
  0xfc   :  { %v237_v48 = vpop.f32.mrb[3].mxu1 }
 0x108   :  { %v971_v53 = vpop.f32.mrb[0].mxu0 }
 0x109   :  { %v1067_v56 = vadd.f32 %v971_v53, %v905_v44  ;;  %v571_v58 = vpop.f32.mrb[1].mxu0 }
 0x10a   :  { %v1068_v59 = vadd.f32 %v571_v58, %v227_v45 }
 0x10b   :  { %v602_v60 = vadd.f32 %v1067_v56, %v797_v54 }
 0x10c   :  { %v601_v61 = vadd.f32 %v1068_v59, %v797_v54  ;;  %v974_v62 = vpop.f32.mrb[2].mxu0 }
 0x10d   :  { %v606_v63 = vmax.f32 %v602_v60, 0.0  ;;  %v1069_v0 = vadd.f32 %v974_v62, %v908_v46  ;;  %v581_v1 = vpop.f32.mrb[3].mxu0 }
 0x10e   :  { %v605_v2 = vmax.f32 %v601_v61, 0.0  ;;  %v1070_v3 = vadd.f32 %v581_v1, %v237_v48 }
 0x10f   :  { %v625_v4 = vsel %vm619_vm8, %v606_v63, 0.0  ;;  %v604_v5 = vadd.f32 %v1069_v0, %v797_v54 }
 0x110   :  { %v630_v6 = vsel %vm628_vm9, %v625_v4, -inf  ;;  %v629_v7 = vsel %vm628_vm9, %v605_v2, -inf  ;;  %v603_v8 = vadd.f32 %v1070_v3, %v797_v54 }
 0x111   :  { %v631_v9 = vmax.f32 %v629_v7, %v630_v6  ;;  %v608_v10 = vmax.f32 %v604_v5, 0.0 }
 0x112   :  { %v607_v11 = vmax.f32 %v603_v8, 0.0 }
 0x113   :  { %v632_v12 = vrot.slane %v631_v9, 4  ;;  %v627_v13 = vsel %vm619_vm8, %v608_v10, 0.0 }
 0x114   :  { %v639_v14 = vsel %vm628_vm9, %v627_v13, -inf  ;;  %v638_v15 = vsel %vm628_vm9, %v607_v11, -inf }
 0x115   :  { %v633_v16 = vmax.f32 %v631_v9, %v632_v12  ;;  %v640_v19 = vmax.f32 %v638_v15, %v639_v14 }
 0x117   :  { %v634_v20 = vrot.slane %v633_v16, 2  ;;  %v641_v21 = vrot.slane %v640_v19, 4 }
 0x119   :  { %v635_v22 = vmax.f32 %v633_v16, %v634_v20  ;;  %v642_v23 = vmax.f32 %v640_v19, %v641_v21 }
 0x11b   :  { %v643_v24 = vrot.slane %v642_v23, 2  ;;  %v636_v25 = vrot.slane %v635_v22, 1 }
 0x11d   :  { %v644_v26 = vmax.f32 %v642_v23, %v643_v24  ;;  %v637_v18 = vmax.f32 %v635_v22, %v636_v25 }
 0x11f   :  { %v645_v17 = vrot.slane %v644_v26, 1 }
 0x121   :  { %v646_v27 = vmax.f32 %v644_v26, %v645_v17 }
 0x123   :  { %v660_v28 = vsel %vm659_vm10, %v646_v27, %v637_v18 }
 0x124   :  { %982 = vmatmul.mubr.msk.f32.vlgmr.msra.gmra.mrb[4].mxu1 %vm628_vm9, %v660_v28 }
 0x1f7   :  { %v729_v30 = vpop.f32.mrb[4].mxu1 }
 0x1f8   :  { %v730_v32 = vadd.f32 %v798_v29, %v729_v30  ;;  %v983_v33 = vpop.f32.mrb[5].mxu1 }
 0x1fa   :  { %v800_v34 = vmul.f32 -1.442695, %v730_v32 }
 0x1fc   :  { %1087 = vpow2.f32 %v800_v34 }
 0x206   :  { %v1088_v35 = vpop.eup %1087 }
 0x207   :  { %v736_v36 = vadd.f32 1.0, %v1088_v35 }
 0x209   :  { %1089 = vrcp.f32 %v736_v36 }
 0x213   :  { %v1090_v37 = vpop.eup %1089 }
 0x214   :  { %740 = vst.msk [vmem:[%s1360_s5] sm:$0x3] %vm739_vm11, %v1090_v37 }

</bundles_post_ra>
